<compile_context>
chip_gen: v6e
topology: v6e:2x2x1
jax: 0.10.0
libtpu: 0.0.40
codegen_flags: <defaults>
</compile_context>

<pallas_src>
import functools
import math

import jax
import jax.numpy as jnp
from jax.experimental import pallas as pl
from jax.experimental.pallas import tpu as pltpu

LANES = 128
ROW_MULT = 16   # sublane quantum that is legal for both f32 (8) and bf16 (16) blocks


def _round_up(x, m):
    return (x + m - 1) // m * m


def _lcm(a, b):
    return a * b // math.gcd(a, b)


def nodemlp_kernel(x_ref, w_ref, b_ref, o_ref, *, compute_dtype):
    # x_ref: (tile, Kf) input dtype; w_ref: (Kf, Nf) compute dtype;
    # b_ref: (1, Nf) f32; o_ref: (tile, Nf) out dtype.
    x = x_ref[...].astype(compute_dtype)        # in-kernel cast: no extra HBM pass
    acc = jnp.dot(x, w_ref[...], preferred_element_type=jnp.float32)
    acc = acc + b_ref[...]                      # f32 bias-add (broadcast over rows)
    o_ref[...] = jnp.maximum(acc, 0.0).astype(o_ref.dtype)


def _choose_fold(in_features, out_features, w_itemsize, max_weight_bytes=8 << 20):
    """Smallest fold making Kf=fold*IN and Nf=fold*OUT multiples of 128 lanes."""
    f_out = LANES // math.gcd(out_features, LANES)   # Nf lane-dense
    f_in = LANES // math.gcd(in_features, LANES)     # Kf lane-dense
    for fold in (_lcm(f_out, f_in), f_out, 1):       # cap block-diag weight growth
        w_bytes = (fold * in_features) * (fold * out_features) * w_itemsize
        if w_bytes <= max_weight_bytes:
            return fold
    return 1


def prepare_nodemlp_params(weight, bias, *, compute_dtype=jnp.bfloat16):
    """One-time parameter prep (do at load time, not per forward).

    weight: (OUT, IN) PyTorch layout, bias: (OUT,).
      * pre-transpose to (IN, OUT) so the kernel matmul is transpose-free
      * lane-fold: block-diagonal (fold*IN, fold*OUT) weight so both the kernel
        input and output last dims are full multiples of 128 lanes
      * weight stored in compute_dtype (bf16); bias stays f32 (f32 accumulator)
    """
    OUT, IN = weight.shape
    w_t = weight.T.astype(jnp.float32)                        # (IN, OUT)
    fold = _choose_fold(IN, OUT, jnp.dtype(compute_dtype).itemsize)

    if fold > 1:
        w_t = jnp.kron(jnp.eye(fold, dtype=jnp.float32), w_t)         # (fold*IN, fold*OUT)
        b2d = jnp.tile(bias.astype(jnp.float32), fold).reshape(1, fold * OUT)
    else:
        b2d = bias.astype(jnp.float32).reshape(1, OUT)

    return {
        "w": w_t.astype(compute_dtype),
        "b": b2d,
        "in_features": IN,
        "out_features": OUT,
        "fold": fold,
        "compute_dtype": compute_dtype,
    }


def nodemlp_forward(h, params, *, tm=2048, out_dtype=None):
    """h: (N, IN). Returns relu(h @ W^T + b) of shape (N, OUT).

    out_dtype: result dtype (default h.dtype).  Pass jnp.bfloat16 when the
    consumer allows it to halve the dominant output HBM stream.
    """
    N, IN = h.shape
    assert IN == params["in_features"]
    OUT = params["out_features"]
    fold = params["fold"]
    cdt = params["compute_dtype"]
    out_dtype = h.dtype if out_dtype is None else out_dtype

    w = params["w"]                               # (Kf, Nf) compute dtype
    b = params["b"]                               # (1, Nf) f32
    Kf = fold * IN
    Nf = fold * OUT

    # Lane-fold: view (N, IN) as (N/fold, fold*IN).  Row-major reshape only
    # (layout plumbing) -- no dtype cast and no full-array pad in the wrapper.
    n_pad = _round_up(N, fold)
    x = h
    if n_pad != N:
        # Rare ragged tail (< fold rows).
        # TODO(synk): absorb this tiny tail pad into a masked last block instead of an XLA pad.
        x = jnp.pad(x, ((0, n_pad - N), (0, 0)))
    n_rows = n_pad // fold
    if fold > 1:
        x = x.reshape(n_rows, Kf)

    # Row tile: large (amortizes ~0.35us per grid step); ragged last block is
    # handled by Pallas (no row padding).  Keep >= 2 grid steps when there is
    # enough work so the "parallel" axis can shard across v7x's 2 TensorCores.
    tm = max(ROW_MULT, _round_up(tm, ROW_MULT))
    if n_rows > tm:
        tile = tm
    elif n_rows >= 2 * ROW_MULT:
        tile = _round_up(-(-n_rows // 2), ROW_MULT)   # split into ~2 layout-legal tiles
    else:
        tile = n_rows                                  # single block == full array dim
    grid = (pl.cdiv(n_rows, tile),)

    # Advisory cost: true FLOPs / bytes (no block-diagonal zeros, no pad rows).
    x_it = jnp.dtype(h.dtype).itemsize
    w_it = jnp.dtype(w.dtype).itemsize
    o_it = jnp.dtype(out_dtype).itemsize
    cost = pl.CostEstimate(
        flops=2 * N * IN * OUT,
        transcendentals=0,
        bytes_accessed=N * IN * x_it + Kf * Nf * w_it + Nf * 4 + N * OUT * o_it,
    )

    # Explicit VMEM budget (matters most on v7x's 64 MiB): double-buffered
    # x/out tiles + resident weight/bias, with headroom.
    vmem_need = (2 * tile * Kf * x_it + 2 * tile * Nf * o_it
                 + 2 * Kf * Nf * w_it + 2 * Nf * 4)
    vmem_limit = int(min(96 << 20, max(32 << 20, vmem_need + (8 << 20))))

    out = pl.pallas_call(
        functools.partial(nodemlp_kernel, compute_dtype=cdt),
        out_shape=jax.ShapeDtypeStruct((n_rows, Nf), out_dtype),
        grid_spec=pltpu.PrefetchScalarGridSpec(
            num_scalar_prefetch=0,
            grid=grid,
            in_specs=[
                pl.BlockSpec((tile, Kf), lambda i: (i, 0)),   # row tile of x (orig dtype)
                pl.BlockSpec((Kf, Nf), lambda i: (0, 0)),     # resident bf16 weight
                pl.BlockSpec((1, Nf), lambda i: (0, 0)),      # resident f32 bias
            ],
            out_specs=pl.BlockSpec((tile, Nf), lambda i: (i, 0)),  # lane-dense out
        ),
        compiler_params=pltpu.CompilerParams(
            dimension_semantics=("parallel",),        # megacore / TC-shardable row axis
            vmem_limit_bytes=vmem_limit,
            allow_input_fusion=[True, False, False],  # fold the x reshape/pad into the input feed
        ),
        cost_estimate=cost,
    )(x, w, b)

    if fold > 1:
        out = out.reshape(n_pad, OUT)                 # un-fold rows (layout plumbing)
    if n_pad != N:
        out = out[:N]
    return out


if __name__ == "__main__":
    key = jax.random.PRNGKey(0)
    k_h, k_w, k_b = jax.random.split(key, 3)

    # nodemlp_size = (32, 64); 16 "node" rows (e.g. batch=2 * nodes=8)
    N, IN, OUT = 16, 32, 64

    h = jax.random.normal(k_h, (N, IN), dtype=jnp.float32)
    # Deterministic init mimicking nn.Linear's uniform(-1/sqrt(in), 1/sqrt(in))
    bound = 1.0 / jnp.sqrt(jnp.float32(IN))
    weight = jax.random.uniform(k_w, (OUT, IN), jnp.float32, -bound, bound)
    bias = jax.random.uniform(k_b, (OUT,), jnp.float32, -bound, bound)

    params = prepare_nodemlp_params(weight, bias, compute_dtype=jnp.bfloat16)

    out = nodemlp_forward(h, params)                           # f32 out (module semantics)
    out_bf16 = nodemlp_forward(h, params, out_dtype=jnp.bfloat16)
    out = jax.block_until_ready(out)
    out_bf16 = jax.block_until_ready(out_bf16)

    # Tight check vs a reference using the same bf16-cast operands (f32 accumulate),
    # plus a looser check against the pure-f32 PyTorch semantics.
    h_c = h.astype(jnp.bfloat16).astype(jnp.float32)
    w_c = weight.astype(jnp.bfloat16).astype(jnp.float32)
    ref_bf16 = jnp.maximum(h_c @ w_c.T + bias, 0.0)
    ref_f32 = jnp.maximum(h @ weight.T + bias, 0.0)

    assert out.shape == (N, OUT)
    assert out_bf16.shape == (N, OUT) and out_bf16.dtype == jnp.bfloat16
    assert jnp.allclose(out, ref_bf16, atol=1e-3, rtol=1e-3), "mismatch vs bf16 reference"
    assert jnp.allclose(out, ref_f32, atol=5e-2, rtol=5e-2), "mismatch vs f32 reference"
    assert jnp.allclose(out_bf16.astype(jnp.float32), ref_bf16, atol=3e-2, rtol=3e-2), \
        "bf16-output mismatch"

    print("KERNEL_OK")
</pallas_src>

<mosaic_0001>
module attributes {stable_mosaic.version = 11 : i64} {
  func.func @nodemlp_kernel(%arg0: i32, %arg1: memref<4x128xf32, #tpu.memory_space<vmem>>, %arg2: memref<128x256xbf16, #tpu.memory_space<vmem>>, %arg3: memref<1x256xf32, #tpu.memory_space<vmem>>, %arg4: memref<4x256xf32, #tpu.memory_space<vmem>>) attributes {dimension_semantics = [#tpu.dimension_semantics<parallel>], iteration_bounds = array<i64: 1>, scalar_prefetch = 0 : i64, scratch_operands = 0 : i64, tpu.core_type = #tpu.core_type<tc>, window_params = [{transform_indices = @transform_0, window_bounds = array<i64: 4, 128>}, {pipeline_mode = #tpu.pipeline_mode<synchronous>, transform_indices = @transform_1, window_bounds = array<i64: 128, 256>}, {pipeline_mode = #tpu.pipeline_mode<synchronous>, transform_indices = @transform_2, window_bounds = array<i64: 1, 256>}, {transform_indices = @transform_3, window_bounds = array<i64: 4, 256>}]} {
    %c0 = arith.constant 0 : index
    %c0_0 = arith.constant 0 : index
    %0 = vector.load %arg1[%c0, %c0_0] : memref<4x128xf32, #tpu.memory_space<vmem>>, vector<4x128xf32>
    %1 = arith.truncf %0 : vector<4x128xf32> to vector<4x128xbf16>
    %c0_1 = arith.constant 0 : index
    %c0_2 = arith.constant 0 : index
    %2 = vector.load %arg2[%c0_1, %c0_2] : memref<128x256xbf16, #tpu.memory_space<vmem>>, vector<128x256xbf16>
    %cst = arith.constant dense<0.000000e+00> : vector<4x256xf32>
    %3 = tpu.matmul %1, %2, %cst {dimension_numbers = #tpu.dot_dimension_numbers<[1], [0], [0], [1], [0, 0, 1, 1], [], []>} : vector<4x128xbf16>, vector<128x256xbf16>, vector<4x256xf32> -> vector<4x256xf32>
    %c0_3 = arith.constant 0 : index
    %c0_4 = arith.constant 0 : index
    %4 = vector.load %arg3[%c0_3, %c0_4] : memref<1x256xf32, #tpu.memory_space<vmem>>, vector<1x256xf32>
    %5 = vector.broadcast %4 : vector<1x256xf32> to vector<4x256xf32>
    %6 = arith.addf %3, %5 : vector<4x256xf32>
    %cst_5 = arith.constant 0.000000e+00 : f32
    %7 = vector.broadcast %cst_5 : f32 to vector<4x256xf32>
    %8 = arith.maximumf %6, %7 : vector<4x256xf32>
    %c0_6 = arith.constant 0 : index
    %c0_7 = arith.constant 0 : index
    %9 = vector.load %arg4[%c0_6, %c0_7] : memref<4x256xf32, #tpu.memory_space<vmem>>, vector<4x256xf32>
    tpu.vector_store %arg4[%c0_6, %c0_7], %8 {strides = array<i32>} : memref<4x256xf32, #tpu.memory_space<vmem>>, vector<4x256xf32>,
    return
  }
  func.func @transform_0(%arg0: i32) -> (i32, i32) {
    %c0_i32 = arith.constant 0 : i32
    %c0_i32_0 = arith.constant 0 : i32
    return %arg0, %c0_i32 : i32, i32
  }
  func.func @transform_1(%arg0: i32) -> (i32, i32) {
    %c0_i32 = arith.constant 0 : i32
    %c0_i32_0 = arith.constant 0 : i32
    %c0_i32_1 = arith.constant 0 : i32
    return %c0_i32, %c0_i32_0 : i32, i32
  }
  func.func @transform_2(%arg0: i32) -> (i32, i32) {
    %c0_i32 = arith.constant 0 : i32
    %c0_i32_0 = arith.constant 0 : i32
    %c0_i32_1 = arith.constant 0 : i32
    return %c0_i32, %c0_i32_0 : i32, i32
  }
  func.func @transform_3(%arg0: i32) -> (i32, i32) {
    %c0_i32 = arith.constant 0 : i32
    %c0_i32_0 = arith.constant 0 : i32
    return %arg0, %c0_i32 : i32, i32
  }
}

</mosaic_0001>

<bundles_post_ra>
// kernel: tpu_custom_call.1
= control target key start
LH: loop header
LB: loop body
LE: loop exit
PB: predicated region body
PF: predicated region fallthrough
CT: control target
= control target key end

     0   :  { %8 = vsyncpa [#allocation3], 0  ;;  %s366_s0 = inlined_call_operand.hbm [shape: f32[4,128], index: 0, kind: input, shape index: {}]   ;;  %s367_s1 = inlined_call_operand.hbm [shape: bf16[128,256], index: 1, kind: input, shape index: {}]   ;;  %s368_s2 = inlined_call_operand.vmem [shape: f32[1,256], index: 2, kind: input, shape index: {}]   ;;  %s369_s3 = inlined_call_operand.hbm [shape: f32[4,256], index: 3, kind: output, shape index: {}]  }
   0x1   :  { %9 = vsyncpa [#allocation6], 0 }
   0x2   :  { %10 = vsyncpa [#allocation4], 0  ;;  %s328_s12 = smov [#allocation2]   ;;  %s329_s14 = smov [#allocation5]  }
   0x3   :  { %s17_s13 = sshll.u32 %s328_s12, 4  ;;  %s26_s15 = sshll.u32 %s329_s14, 4  ;;  %s18_s13 = int_to_ptr.vmem [resolvable:$true] %s17_s13  ;;  %s27_s15 = int_to_ptr.vmem [resolvable:$true] %s26_s15 }
   0x4   :  { %s270_s16 = scalar_lea.vmem %s18_s13, 64  ;;  %p275_p1 = scmp.lt.s32.totalorder %s18_s13, %s18_s13 }
   0x5   :  { %p271_p0 = scmp.ne.s32.totalorder %s18_s13, %s270_s16  ;;  %p276_p2 = scmp.lt.s32.totalorder %s270_s16, %s270_s16 }
   0x7   :  { %p277_p3 = por %p276_p2, %p275_p1 }
   0x9   :  { %p278_p4 = pnand %p277_p3, %p271_p0 }
   0xb   :  { %281 = shalt.err (!%p278_p4)
}
   0xc   :  { %20 = dma.hbm_to_vmem [thread:$0]  %s366_s0, 64, %s18_s13, [#allocation3]  }
   0xd   :  { %s290_s19 = scalar_lea.vmem %s27_s15, 2048  ;;  %p295_p6 = scmp.lt.s32.totalorder %s27_s15, %s27_s15 }
   0xe   :  { %p291_p5 = scmp.ne.s32.totalorder %s27_s15, %s290_s19  ;;  %p296_p7 = scmp.lt.s32.totalorder %s290_s19, %s290_s19 }
  0x10   :  { %p297_p8 = por %p296_p7, %p295_p6 }
  0x12   :  { %p298_p9 = pnand %p297_p8, %p291_p5 }
  0x14   :  { %301 = shalt.err (!%p298_p9)
}
  0x15   :  { %s330_s20 = smov 128   ;;  %s331_s21 = smov 8  }
  0x16   :  { %32 = dma.hbm_to_vmem [thread:$0]  %s367_s1, 2048, %s27_s15, [#allocation6], %s330_s20, %s330_s20, %s331_s21  }
  0x17   :  { %322 = dma.done.wait [#allocation3], 64  }
  0x18   :  { %323 = vsyncadd [#allocation3], 4294967232 }
  0x19   :  { %324 = dma.done.wait [#allocation6], 2048  }
  0x1a   :  { %325 = vsyncadd [#allocation6], 4294965248  ;;  %v332_v0 = vmov 0   ;;  %v238_v1 = vld [vmem:[#allocation5 + $0x74] ss:$8 sps:$4 sm:$0xff]   ;;  %v62_v19 = vlaneseq  ;;  %s333_s24 = smov [#allocation7]  }
  0x1b   :  { %184 = vmatprep.mubr.bf16.mxu0 %v332_v0  ;;  %v240_v2 = vld [vmem:[#allocation5 + $0x70] ss:$8 sps:$4 sm:$0xff]   ;;  %152 = vmatprep.subr.bf16.mxu0 %v238_v1  ;;  %v241_v3 = vld [vmem:[#allocation5 + $0x64] ss:$8 sps:$4 sm:$0xff]   ;;  %v243_v4 = vld [vmem:[#allocation5 + $0x60] ss:$8 sps:$4 sm:$0xff]  }
  0x1c   :  { %153 = vmatpush1.bf16.msra.mxu0 %v240_v2  ;;  %v244_v5 = vld [vmem:[#allocation5 + $0x54] ss:$8 sps:$4 sm:$0xff]   ;;  %v246_v6 = vld [vmem:[#allocation5 + $0x50] ss:$8 sps:$4 sm:$0xff]   ;;  %v247_v7 = vld [vmem:[#allocation5 + $0x44] ss:$8 sps:$4 sm:$0xff]  }
  0x1d   :  { %154 = vmatprep.subr.bf16.mxu0 %v241_v3  ;;  %v249_v8 = vld [vmem:[#allocation5 + $0x40] ss:$8 sps:$4 sm:$0xff]   ;;  %v250_v9 = vld [vmem:[#allocation5 + $0x34] ss:$8 sps:$4 sm:$0xff]   ;;  %v252_v10 = vld [vmem:[#allocation5 + $0x30] ss:$8 sps:$4 sm:$0xff]  }
  0x1e   :  { %v253_v11 = vld [vmem:[#allocation5 + $0x24] ss:$8 sps:$4 sm:$0xff]   ;;  %v255_v12 = vld [vmem:[#allocation5 + $0x20] ss:$8 sps:$4 sm:$0xff]   ;;  %v256_v13 = vld [vmem:[#allocation5 + $0x14] ss:$8 sps:$4 sm:$0xff]  }
  0x1f   :  { %v258_v14 = vld [vmem:[#allocation5 + $0x10] ss:$8 sps:$4 sm:$0xff]   ;;  %v259_v15 = vld [vmem:[#allocation5 + $0x4] ss:$8 sps:$4 sm:$0xff]   ;;  %v261_v16 = vld [vmem:[#allocation5] ss:$8 sps:$4 sm:$0xff]  }
  0x20   :  { %155 = vmatpush1.bf16.msra.mxu0 %v243_v4  ;;  %v42_v17 = vld [vmem:[#allocation2] sm:$0xf]  ;;  %v63_v20 = vshrl.u32 %v62_v19, 7  ;;  %s206_s25 = sshll.u32 %s333_s24, 4  ;;  %s207_s25 = int_to_ptr.vmem [resolvable:$true] %s206_s25 }
  0x21   :  { %156 = vmatprep.subr.bf16.mxu0 %v244_v5  ;;  %v43_v18 = vpack.c.bf16 %v42_v17, %v42_v17  ;;  %v60_v22 = vld [vmem:[%s368_s2] sm:$0x3]  ;;  %s302_s26 = scalar_lea.vmem %s207_s25, 128  ;;  %p307_p11 = scmp.lt.s32.totalorder %s207_s25, %s207_s25 }
  0x22   :  { %v64_v21 = vsub.s32 0, %v63_v20  ;;  %v68_v23 = vsub.s32 1, %v63_v20  ;;  %p303_p10 = scmp.ne.s32.totalorder %s207_s25, %s302_s26  ;;  %p308_p12 = scmp.lt.s32.totalorder %s302_s26, %s302_s26 }
  0x24   :  { %157 = vmatpush1.bf16.msra.mxu0 %v246_v6  ;;  %v65_v24 = vrot.slane %v60_v22, %v64_v21  ;;  %v69_v25 = vrot.slane %v60_v22, %v68_v23  ;;  %p309_p13 = por %p308_p12, %p307_p11 }
  0x25   :  { %158 = vmatprep.subr.bf16.mxu0 %v247_v7 }
  0x26   :  { %p310_p0 = pnand %p309_p13, %p303_p10 }
  0x28   :  { %159 = vmatpush1.bf16.msra.mxu0 %v249_v8 }
  0x29   :  { %160 = vmatprep.subr.bf16.mxu0 %v250_v9 }
  0x2c   :  { %161 = vmatpush1.bf16.msra.mxu0 %v252_v10 }
  0x2d   :  { %162 = vmatprep.subr.bf16.mxu0 %v253_v11 }
  0x30   :  { %163 = vmatpush1.bf16.msra.mxu0 %v255_v12 }
  0x31   :  { %164 = vmatprep.subr.bf16.mxu0 %v256_v13 }
  0x34   :  { %165 = vmatpush1.bf16.msra.mxu0 %v258_v14 }
  0x35   :  { %166 = vmatprep.subr.bf16.mxu0 %v259_v15 }
  0x38   :  { %167 = vmatpush1.bf16.msra.mxu0 %v261_v16 }
  0x3b   :  { %185 = vmatmul.mubr.bf16.vlgmr.msra.gmra.mxu0 %v43_v18 }
  0xfb   :  { %v186_v26 = vpop.f32.mrf.mxu0 }
  0xfc   :  { %v187_v27 = vadd.f32 %v186_v26, %v65_v24 }
  0xfd   :  { %v188_v28 = vpop.f32.mrf.mxu0 }
  0xfe   :  { %v189_v29 = vadd.f32 %v188_v28, %v69_v25  ;;  %v193_v31 = vmax.f32 %v187_v27, 0.0 }
  0xff   :  { %v190_v30 = vpop.f32.mrf.mxu0 }
 0x100   :  { %v194_v32 = vmax.f32 %v189_v29, 0.0 }
 0x101   :  { %v191_v33 = vpop.f32.mrf.mxu0 }
 0x102   :  { %v197_v34 = vcombine.low %v193_v31, %v194_v32 }
 0x104   :  { %199 = vst [vmem:[#allocation7] sm:$0xff] %v197_v34 }
 0x105   :  { %313 = shalt.err (!%p310_p0)
}
 0x106   :  { %209 = dma.vmem_to_hbm [thread:$0]  %s207_s25, 128, %s369_s3, [#allocation4]  }
 0x107   :  { %326 = dma.done.wait [#allocation4], 128  }
 0x108   :  { %327 = vsyncadd [#allocation4], 4294967168 }
 0x109   :  { %213 = vsyncpa [#allocation3], 1 }
 0x10a   :  { %214 = vsyncpa [#allocation6], 1 }
 0x10b   :  { %215 = vsyncpa [#allocation4], 1 }

</bundles_post_ra>
